<compile_context>
chip_gen: v7x
topology: tpu7x:2x2x1
jax: 0.10.0
libtpu: 0.0.40
codegen_flags: <defaults>
</compile_context>

<pallas_src>
import functools

import jax
import jax.numpy as jnp
from jax.experimental import pallas as pl
from jax.experimental.pallas import tpu as pltpu


def get_sin_pos_enc(seq_len: int, d_model: int) -> jnp.ndarray:
    """Sinusoid absolute positional encoding (matches the torch reference)."""
    inv_freq = 1.0 / (10000.0 ** (jnp.arange(0.0, d_model, 2.0) / d_model))
    pos_seq = jnp.arange(seq_len - 1, -1, -1, dtype=inv_freq.dtype)
    sinusoid_inp = jnp.outer(pos_seq, inv_freq)
    pos_emb = jnp.concatenate(
        [jnp.sin(sinusoid_inp), jnp.cos(sinusoid_inp)], axis=-1)
    return pos_emb[None]  # [1, seq_len, d_model]


def _encoder_kernel(x_ref, w_ref, add_ref, o_ref):
    # x_ref:   (tm, K)   rows = (b, h) flattened, K = num_slots * in_dim
    # w_ref:   (K, N)    block-diagonal weight, N = num_slots * slot_size
    # add_ref: (1, N)    bias + alpha * pos_emb (slot-major); broadcast over rows
    # o_ref:   (tm, N)
    o_ref[...] = (
        jnp.dot(x_ref[...], w_ref[...], preferred_element_type=jnp.float32)
        + add_ref[...]
    ).astype(o_ref.dtype)


def _choose_tm(M: int, target_tm: int, min_blocks: int = 2) -> int:
    """Row tile: multiple of 8 (sublanes), capped so medium problems get >= 2
    grid steps (v7x megacore); tiny problems use a single full-array block."""
    if M <= 8:
        return M  # block_shape == full array dims -> no divisibility requirement
    cap = -(-M // min_blocks)              # ceil(M / min_blocks)
    cap = max(8, ((cap + 7) // 8) * 8)     # round up to sublane multiple
    tm = min(max(8, (target_tm // 8) * 8), cap)
    return tm


@functools.partial(
    jax.jit,
    static_argnames=("num_slots", "slot_size", "target_tm", "out_dtype"))
def trajectory_to_slot_encoder(x, weight, bias, pos_emb, alpha=1.0, *,
                               num_slots, slot_size,
                               target_tm=4096, out_dtype=None):
    """x: [B, H, num_slots*in_dim] -> [B, H, num_slots*slot_size]."""
    B, H, input_dim = x.shape
    in_dim = input_dim // num_slots
    K = num_slots * in_dim
    N = num_slots * slot_size
    M = B * H
    out_dtype = jnp.dtype(x.dtype if out_dtype is None else out_dtype)

    # Zero-copy flatten to the (b, h)-row view (row = one horizon step).
    x2 = x.reshape(M, K)

    # Block-diagonal weight: slot s only sees its own in_dim features.
    w_bd = jnp.kron(jnp.eye(num_slots, dtype=weight.dtype), weight)  # (K, N)

    # Single additive row: per-slot bias + alpha * positional embedding.
    addend = (bias[None, :] + alpha * pos_emb[0]).reshape(1, N).astype(jnp.float32)

    tm = _choose_tm(M, target_tm)
    grid_m = pl.cdiv(M, tm)

    # VMEM budget: double-buffered x / out tiles + grid-invariant w / addend.
    tile_bytes = (2 * (tm * K * x2.dtype.itemsize + tm * N * out_dtype.itemsize)
                  + 2 * K * N * w_bd.dtype.itemsize + 2 * 8 * N * 4)
    vmem_limit = int(min(96 * 2**20, max(32 * 2**20, tile_bytes * 3 // 2)))

    cost = pl.CostEstimate(
        flops=2 * M * K * N,
        transcendentals=0,
        bytes_accessed=(M * K * x2.dtype.itemsize
                        + M * N * out_dtype.itemsize
                        + K * N * w_bd.dtype.itemsize
                        + 4 * N))

    out = pl.pallas_call(
        _encoder_kernel,
        out_shape=jax.ShapeDtypeStruct((M, N), out_dtype),
        grid_spec=pltpu.PrefetchScalarGridSpec(
            num_scalar_prefetch=0,
            grid=(grid_m,),
            in_specs=[
                pl.BlockSpec((tm, K), lambda i: (i, 0)),   # streamed rows
                pl.BlockSpec((K, N), lambda i: (0, 0)),    # grid-invariant weight
                pl.BlockSpec((1, N), lambda i: (0, 0)),    # grid-invariant addend
            ],
            out_specs=pl.BlockSpec((tm, N), lambda i: (i, 0)),
        ),
        compiler_params=pltpu.CompilerParams(
            dimension_semantics=("parallel",),
            vmem_limit_bytes=vmem_limit),
        cost_estimate=cost,
    )(x2, w_bd, addend)

    return out.reshape(B, H, N)


def _reference(x, weight, bias, pos_emb, num_slots, slot_size, alpha):
    B, H, _ = x.shape
    slots = x.reshape(B, H, num_slots, -1) @ weight + bias
    slots = slots.reshape(B, H, num_slots * slot_size)
    enc_pe = jnp.broadcast_to(
        pos_emb, (B * H, num_slots, slot_size)).reshape(B, H, num_slots * slot_size)
    return slots + alpha * enc_pe


if __name__ == "__main__":
    num_slots = 4
    in_dim = 16            # per-slot obs dim (nn.Linear input dim)
    slot_size = 128
    alpha = 1.0

    key = jax.random.PRNGKey(0)
    kx, kw, kb, kx2, kx3 = jax.random.split(key, 5)

    # Deterministic Linear(in_dim, slot_size) params (applied as x @ W + b).
    weight = (jax.random.normal(kw, (in_dim, slot_size), dtype=jnp.float32)
              / jnp.sqrt(jnp.float32(in_dim)))
    bias = jax.random.normal(kb, (slot_size,), dtype=jnp.float32) * 0.01
    pos_emb = get_sin_pos_enc(num_slots, slot_size)  # [1, num_slots, slot_size]

    # --- Test 1: M = 16 -> two evenly divided row blocks (tm = 8, grid = 2). ---
    B, H = 2, 8
    x = jax.random.normal(kx, (B, H, num_slots * in_dim), dtype=jnp.float32)
    out = trajectory_to_slot_encoder(
        x, weight, bias, pos_emb, alpha, num_slots=num_slots, slot_size=slot_size)
    out = jax.block_until_ready(out)
    ref = _reference(x, weight, bias, pos_emb, num_slots, slot_size, alpha)
    assert out.shape == (B, H, num_slots * slot_size)
    assert jnp.allclose(out, ref, atol=1e-5, rtol=1e-5)

    # --- Test 2: ragged tail: M = 22, tm = 16, grid = 2, last block 6 valid rows. ---
    B2, H2 = 2, 11
    xb = jax.random.normal(kx2, (B2, H2, num_slots * in_dim), dtype=jnp.float32)
    out_b = trajectory_to_slot_encoder(
        xb, weight, bias, pos_emb, alpha, num_slots=num_slots, slot_size=slot_size)
    out_b = jax.block_until_ready(out_b)
    ref_b = _reference(xb, weight, bias, pos_emb, num_slots, slot_size, alpha)
    assert out_b.shape == (B2, H2, num_slots * slot_size)
    assert jnp.allclose(out_b, ref_b, atol=1e-5, rtol=1e-5)

    # --- Test 3: tiny M = 4 -> single full-array block (grid = 1). ---
    B3, H3 = 1, 4
    xt = jax.random.normal(kx3, (B3, H3, num_slots * in_dim), dtype=jnp.float32)
    out_t = trajectory_to_slot_encoder(
        xt, weight, bias, pos_emb, alpha, num_slots=num_slots, slot_size=slot_size)
    out_t = jax.block_until_ready(out_t)
    ref_t = _reference(xt, weight, bias, pos_emb, num_slots, slot_size, alpha)
    assert jnp.allclose(out_t, ref_t, atol=1e-5, rtol=1e-5)

    print("KERNEL_OK")
</pallas_src>

<mosaic_0001>
module attributes {stable_mosaic.version = 11 : i64} {
  func.func @_encoder_kernel(%arg0: i32, %arg1: memref<8x64xf32, #tpu.memory_space<vmem>>, %arg2: memref<64x512xf32, #tpu.memory_space<vmem>>, %arg3: memref<1x512xf32, #tpu.memory_space<vmem>>, %arg4: memref<8x512xf32, #tpu.memory_space<vmem>>) attributes {dimension_semantics = [#tpu.dimension_semantics<parallel>], iteration_bounds = array<i64: 2>, scalar_prefetch = 0 : i64, scratch_operands = 0 : i64, tpu.core_type = #tpu.core_type<tc>, window_params = [{transform_indices = @transform_0, window_bounds = array<i64: 8, 64>}, {pipeline_mode = #tpu.pipeline_mode<synchronous>, transform_indices = @transform_1, window_bounds = array<i64: 64, 512>}, {pipeline_mode = #tpu.pipeline_mode<synchronous>, transform_indices = @transform_2, window_bounds = array<i64: 1, 512>}, {transform_indices = @transform_3, window_bounds = array<i64: 8, 512>}]} {
    %c0 = arith.constant 0 : index
    %c0_0 = arith.constant 0 : index
    %0 = vector.load %arg1[%c0, %c0_0] : memref<8x64xf32, #tpu.memory_space<vmem>>, vector<8x64xf32>
    %c0_1 = arith.constant 0 : index
    %c0_2 = arith.constant 0 : index
    %1 = vector.load %arg2[%c0_1, %c0_2] : memref<64x512xf32, #tpu.memory_space<vmem>>, vector<64x512xf32>
    %cst = arith.constant dense<0.000000e+00> : vector<8x512xf32>
    %2 = tpu.matmul %0, %1, %cst {dimension_numbers = #tpu.dot_dimension_numbers<[1], [0], [0], [1], [0, 0, 1, 1], [], []>} : vector<8x64xf32>, vector<64x512xf32>, vector<8x512xf32> -> vector<8x512xf32>
    %c0_3 = arith.constant 0 : index
    %c0_4 = arith.constant 0 : index
    %3 = vector.load %arg3[%c0_3, %c0_4] : memref<1x512xf32, #tpu.memory_space<vmem>>, vector<1x512xf32>
    %4 = vector.broadcast %3 : vector<1x512xf32> to vector<8x512xf32>
    %5 = arith.addf %2, %4 : vector<8x512xf32>
    %c0_5 = arith.constant 0 : index
    %c0_6 = arith.constant 0 : index
    %6 = vector.load %arg4[%c0_5, %c0_6] : memref<8x512xf32, #tpu.memory_space<vmem>>, vector<8x512xf32>
    tpu.vector_store %arg4[%c0_5, %c0_6], %5 {strides = array<i32>} : memref<8x512xf32, #tpu.memory_space<vmem>>, vector<8x512xf32>,
    return
  }
  func.func @transform_0(%arg0: i32) -> (i32, i32) {
    %c0_i32 = arith.constant 0 : i32
    %c0_i32_0 = arith.constant 0 : i32
    return %arg0, %c0_i32 : i32, i32
  }
  func.func @transform_1(%arg0: i32) -> (i32, i32) {
    %c0_i32 = arith.constant 0 : i32
    %c0_i32_0 = arith.constant 0 : i32
    %c0_i32_1 = arith.constant 0 : i32
    return %c0_i32, %c0_i32_0 : i32, i32
  }
  func.func @transform_2(%arg0: i32) -> (i32, i32) {
    %c0_i32 = arith.constant 0 : i32
    %c0_i32_0 = arith.constant 0 : i32
    %c0_i32_1 = arith.constant 0 : i32
    return %c0_i32, %c0_i32_0 : i32, i32
  }
  func.func @transform_3(%arg0: i32) -> (i32, i32) {
    %c0_i32 = arith.constant 0 : i32
    %c0_i32_0 = arith.constant 0 : i32
    return %arg0, %c0_i32 : i32, i32
  }
}

</mosaic_0001>

<bundles_post_ra>
// kernel: trajectory_to_slot_encoder.1
= control target key start
LH: loop header
LB: loop body
LE: loop exit
PB: predicated region body
PF: predicated region fallthrough
CT: control target
= control target key end

     0   :  { %8 = vsyncpa [#allocation3], 0  ;;  %s818_s0 = inlined_call_operand.vmem [shape: f32[16,64], index: 0, kind: input, shape index: {}]   ;;  %s819_s1 = inlined_call_operand.vmem [shape: f32[64,512], index: 1, kind: input, shape index: {}]   ;;  %s820_s2 = inlined_call_operand.vmem [shape: f32[1,512], index: 2, kind: input, shape index: {}]   ;;  %s821_s3 = inlined_call_operand.hbm [shape: f32[16,512], index: 3, kind: output, shape index: {}]  }
   0x1   :  { %10 = vsyncpa [#allocation3 + $0x1], 0  ;;  %s617_s12 = smov 0   ;;  %s619_s13 = smov 0  }
   0x2   :  { %s621_s14 = smov 0   ;;  %s623_s15 = smov 0  }
   0x3 LB: > { %s638_s16 = sadd.s32 4294967295, %s593_s15   ;;  %s445_s17 = sadd.s32 4294967294, %s593_s15   ;;  %s593_s15 = sphi %s623_s15, %s827_s15   ;;  %s589_s14 = sphi %s621_s14, %s826_s14   ;;  %s585_s13 = sphi %s619_s13, %s825_s13   ;;  %s581_s12 = sphi %s617_s12, %s824_s12  }
   0x4   : > { %s642_s18 = sadd.s32 1, %s593_s15   ;;  %s91_s19 = sadd.s32 1, %s589_s14 }
   0x5   : > { %s88_s20 = ssub.s32 %s593_s15, %s642_s18  ;;  %p101_p0 = scmp.ne.s32.totalorder %s589_s14, %s585_s13 }
   0x6   : > { %p89_p1 = scmp.eq.s32.totalorder %s88_s20, 0  ;;  %p102_p2 = scmp.eq.s32.totalorder %s638_s16, 1 }
   0x7   : > { %p107_p3 = scmp.ne.s32.totalorder %s585_s13, %s581_s12  ;;  %p108_p4 = scmp.eq.s32.totalorder %s445_s17, 1 }
   0x8   : > { %s653_s21 = scalar_select %p89_p1, %s589_s14, %s91_s19  }
   0x9   : > { %p655_p5 = por %p102_p2, %p101_p0  ;;  %p659_p6 = por %p108_p4, %p107_p3 }
   0xa   : > { %p448_p7 = scmp.ge.s32.totalorder %s593_s15, 1  ;;  %p139_p8 = scmp.lt.s32.totalorder %s593_s15, 3 }
   0xc   : > { %p140_p9 = pnand %p448_p7, %p139_p8 }
   0xd   : > { %v168_v0 = vld [vmem:[%s819_s1 + $0x8] sm:$0xff] (!%p140_p9)  ;;  %v170_v2 = vld [vmem:[%s819_s1 + $0x18] sm:$0xff] (!%p140_p9)  ;;  %v167_v5 = vld [vmem:[%s819_s1] sm:$0xff] (!%p140_p9)  ;;  %v595_v7 = vmov (!%p140_p9), 0.0   ;;  %p162_p10 = scmp.lt.s32.totalorder (!%p140_p9), %s638_s16, 1  ;;  %vm221_vm0 = vcmask (!%p140_p9), 523264   ;;  %v201_v50 = vlaneseq (!%p140_p9) }
   0xe   : > { %143 = sbr.rel (%p140_p9) target bundleno = 263 (0x107), region = 32  ;;  %v172_v1 = vld [vmem:[%s819_s1 + $0x28] sm:$0xff] (!%p140_p9)  ;;  %v174_v4 = vld [vmem:[%s819_s1 + $0x38] sm:$0xff] (!%p140_p9)  ;;  %v171_v6 = vld [vmem:[%s819_s1 + $0x20] sm:$0xff] (!%p140_p9)  ;;  %289 = vmatprep.mubr.f32.mxu0 (!%p140_p9), %v595_v7  ;;  %360 = vmatprep.mubr.f32.mxu1 (!%p140_p9), %v595_v7  ;;  %s458_s25 = sshll.u32 (!%p140_p9), %s638_s16, 9 }
   0xf   : > { %v459_v3 = vpack.c.bf16 (!%p140_p9), %v172_v1, %v168_v0  ;;  %v475_v8 = vpack.c.bf16 (!%p140_p9), %v174_v4, %v170_v2  ;;  %v461_v9 = vpack.c.bf16 (!%p140_p9), %v171_v6, %v167_v5  ;;  %v169_v10 = vld [vmem:[%s819_s1 + $0x10] sm:$0xff] (!%p140_p9)  ;;  %v176_v12 = vld [vmem:[%s819_s1 + $0x48] sm:$0xff] (!%p140_p9)  ;;  %v178_v15 = vld [vmem:[%s819_s1 + $0x58] sm:$0xff] (!%p140_p9)  ;;  %v202_v51 = vshrl.u32 (!%p140_p9), %v201_v50, 7  ;;  %s776_s4 = scalar_lea.hbm (!%p140_p9), %s821_s3, %s458_s25  ;;  %s596_s6 = smov (!%p140_p9), [#allocation2]  }
  0x10   : > { %v173_v11 = vld [vmem:[%s819_s1 + $0x30] sm:$0xff] (!%p140_p9)  ;;  %v180_v14 = vld [vmem:[%s819_s1 + $0x68] sm:$0xff] (!%p140_p9)  ;;  %v182_v16 = vld [vmem:[%s819_s1 + $0x78] sm:$0xff] (!%p140_p9)  ;;  %s535_s7 = sshll.u32 (!%p140_p9), %s596_s6, 4  ;;  %s536_s7 = int_to_ptr.vmem [resolvable:$false] %s535_s7 }
  0x11   : > { %460 = vmatprep.subr.bf16.mxu0 (!%p140_p9), %v459_v3  ;;  %v477_v13 = vpack.c.bf16 (!%p140_p9), %v173_v11, %v169_v10  ;;  %476 = vmatprep.subr.bf16.mxu1 (!%p140_p9), %v475_v8  ;;  %v463_v17 = vpack.c.bf16 (!%p140_p9), %v180_v14, %v176_v12  ;;  %v479_v18 = vpack.c.bf16 (!%p140_p9), %v182_v16, %v178_v15  ;;  %v175_v19 = vld [vmem:[%s819_s1 + $0x40] sm:$0xff] (!%p140_p9)  ;;  %v177_v21 = vld [vmem:[%s819_s1 + $0x50] sm:$0xff] (!%p140_p9)  ;;  %v184_v24 = vld [vmem:[%s819_s1 + $0x88] sm:$0xff] (!%p140_p9)  ;;  %v203_v52 = vsub.s32 (!%p140_p9), 0, %v202_v51  ;;  %s537_s8 = scalar_lea.vmem (!%p140_p9), %s536_s7, 1024 }
  0x12   : > { %462 = vmatpush1.bf16.msra.mxu0 (!%p140_p9), %v461_v9  ;;  %v179_v20 = vld [vmem:[%s819_s1 + $0x60] sm:$0xff] (!%p140_p9)  ;;  %v181_v23 = vld [vmem:[%s819_s1 + $0x70] sm:$0xff] (!%p140_p9)  ;;  %v188_v25 = vld [vmem:[%s819_s1 + $0xa8] sm:$0xff] (!%p140_p9)  ;;  %v211_v54 = vsub.s32 (!%p140_p9), 2, %v202_v51  ;;  %v207_v55 = vsub.s32 (!%p140_p9), 1, %v202_v51  ;;  %v215_v56 = vsub.s32 (!%p140_p9), 3, %v202_v51 }
  0x13   : > { %478 = vmatpush1.bf16.msra.mxu1 (!%p140_p9), %v477_v13  ;;  %v465_v22 = vpack.c.bf16 (!%p140_p9), %v179_v20, %v175_v19  ;;  %464 = vmatprep.subr.bf16.mxu0 (!%p140_p9), %v463_v17  ;;  %v481_v26 = vpack.c.bf16 (!%p140_p9), %v181_v23, %v177_v21  ;;  %v467_v27 = vpack.c.bf16 (!%p140_p9), %v188_v25, %v184_v24  ;;  %v186_v28 = vld [vmem:[%s819_s1 + $0x98] sm:$0xff] (!%p140_p9)  ;;  %v183_v30 = vld [vmem:[%s819_s1 + $0x80] sm:$0xff] (!%p140_p9)  ;;  %v185_v33 = vld [vmem:[%s819_s1 + $0x90] sm:$0xff] (!%p140_p9) }
  0x14   : > { %480 = vmatprep.subr.bf16.mxu1 (!%p140_p9), %v479_v18  ;;  %v190_v29 = vld [vmem:[%s819_s1 + $0xb8] sm:$0xff] (!%p140_p9)  ;;  %v187_v32 = vld [vmem:[%s819_s1 + $0xa0] sm:$0xff] (!%p140_p9)  ;;  %v189_v34 = vld [vmem:[%s819_s1 + $0xb0] sm:$0xff] (!%p140_p9) }
  0x15   : > { %s163_s30 = scalar_select %p162_p10, %s638_s16, 1  ;;  %v483_v31 = vpack.c.bf16 %v190_v29, %v186_v28  ;;  %v469_v35 = vpack.c.bf16 %v187_v32, %v183_v30  ;;  %v192_v36 = vld [vmem:[%s819_s1 + $0xc8] sm:$0xff]  ;;  %v194_v38 = vld [vmem:[%s819_s1 + $0xd8] sm:$0xff]  ;;  %v485_v39 = vpack.c.bf16 %v189_v34, %v185_v33  ;;  %v191_v42 = vld [vmem:[%s819_s1 + $0xc0] sm:$0xff] }
  0x16   : > { %466 = vmatpush1.bf16.msra.mxu0 %v465_v22  ;;  %v196_v37 = vld [vmem:[%s819_s1 + $0xe8] sm:$0xff]  ;;  %v198_v41 = vld [vmem:[%s819_s1 + $0xf8] sm:$0xff]  ;;  %v195_v43 = vld [vmem:[%s819_s1 + $0xe0] sm:$0xff] }
  0x17   : > { %482 = vmatpush1.bf16.msra.mxu1 %v481_v26  ;;  %468 = vmatprep.subr.bf16.mxu0 %v467_v27  ;;  %v471_v40 = vpack.c.bf16 %v196_v37, %v192_v36  ;;  %v487_v44 = vpack.c.bf16 %v198_v41, %v194_v38  ;;  %v193_v45 = vld [vmem:[%s819_s1 + $0xd0] sm:$0xff]  ;;  %s450_s9 = sshll.u32 %s163_s30, 3  ;;  %v473_v47 = vpack.c.bf16 %v195_v43, %v191_v42  ;;  %s159_s30 = sand.u32 1, %s585_s13   ;;  %v199_v53 = vld [vmem:[%s820_s2] sm:$0xf] }
  0x18   : > { %484 = vmatprep.subr.bf16.mxu1 %v483_v31  ;;  %v197_v46 = vld [vmem:[%s819_s1 + $0xf0] sm:$0xff]  ;;  %s165_s17 = scalar_lea.vmem %s818_s0, %s450_s9  ;;  %s449_s19 = sshll.u32 %s159_s30, 5  ;;  %v204_v57 = vrot.slane %v199_v53, %v203_v52  ;;  %v212_v58 = vrot.slane %v199_v53, %v211_v54  ;;  %v208_v59 = vrot.slane %v199_v53, %v207_v55  ;;  %v216_v60 = vrot.slane %v199_v53, %v215_v56 }
  0x19   : > { %v489_v48 = vpack.c.bf16 %v197_v46, %v193_v45  ;;  %v166_v49 = vld [vmem:[%s165_s17] sm:$0xff]  ;;  %s161_s26 = scalar_lea.vmem [#allocation2], %s449_s19  ;;  %s372_s16 = scalar_lea.sflag [#allocation3], %s159_s30 }
  0x1a   : > { %470 = vmatpush1.bf16.msra.mxu0 %v469_v35  ;;  %s386_s27 = sshll.u32 %s161_s26, 4  ;;  %s778_s27 = int_to_ptr.vmem [resolvable:$true] %s386_s27 }
  0x1b   : > { %486 = vmatpush1.bf16.msra.mxu1 %v485_v39  ;;  %472 = vmatprep.subr.bf16.mxu0 %v471_v40  ;;  %s531_s5 = scalar_lea.vmem %s778_s27, 512  ;;  %p538_p0 = scmp.lt.s32.totalorder %s778_s27, %s536_s7 }
  0x1c   : > { %488 = vmatprep.subr.bf16.mxu1 %v487_v44  ;;  %p532_p11 = scmp.ne.s32.totalorder %s778_s27, %s531_s5  ;;  %p539_p1 = scmp.lt.s32.totalorder %s537_s8, %s531_s5 }
  0x1e   : > { %474 = vmatpush1.bf16.msra.mxu0 %v473_v47  ;;  %p533_p12 = pnand %p532_p11, %p655_p5  ;;  %p540_p2 = por %p539_p1, %p538_p0 }
  0x1f   : > { %490 = vmatpush1.bf16.msra.mxu1 %v489_v48 }
  0x20   : > { %p534_p13 = pneg %p533_p12 }
  0x21   : > { %451 = vmatmul.mubr.msk.f32.vlgmr.msra.gmra.mrb[0].mxu0 %vm221_vm0, %v166_v49 }
  0x22   : > { %452 = vmatmul.mubr.msk.f32.vlgmr.msra.gmra.mrb[0].mxu1 %vm221_vm0, %v166_v49  ;;  %p541_p3 = pnand %p540_p2, %p534_p13 }
  0xf4   : > { %v291_v61 = vpop.f32.mrb[0].mxu0 }
  0xf5   : > { %v292_v62 = vadd.f32 %v291_v61, %v204_v57  ;;  %v362_v63 = vpop.f32.mrb[0].mxu1  ;;  %v293_v0 = vpop.f32.mrb[1].mxu0 }
  0xf6   : > { %v363_v1 = vadd.f32 %v362_v63, %v212_v58  ;;  %v294_v2 = vadd.f32 %v293_v0, %v208_v59  ;;  %v364_v3 = vpop.f32.mrb[1].mxu1 }
  0xf7   : > { %367 = vst [vmem:[%s161_s26] sm:$0xff] %v292_v62  ;;  %v365_v4 = vadd.f32 %v364_v3, %v216_v60 }
  0xf8   : > { %369 = vst [vmem:[%s161_s26 + $0x10] sm:$0xff] %v363_v1  ;;  %368 = vst [vmem:[%s161_s26 + $0x8] sm:$0xff] %v294_v2 }
  0xf9   : > { %370 = vst [vmem:[%s161_s26 + $0x18] sm:$0xff] %v365_v4 }
  0xfa   : > { %544 = shalt.err (!%p541_p3)
}
  0xfb   : > { %s545_s9 = scalar_lea.hbm %s776_s4, 512  ;;  %s549_s17 = scalar_lea.hbm %s821_s3, 1024 }
  0xfc   : > { %p546_p4 = scmp.ne.s32.totalorder %s776_s4, %s545_s9  ;;  %p550_p9 = scmp.lt.u32.totalorder %s776_s4, %s821_s3 }
  0xfd   : > { %p551_p10 = scmp.lt.u32.totalorder %s549_s17, %s545_s9  ;;  %p553_p12 = scmp.lt.u32.totalorder %s545_s9, %s776_s4 }
  0xfe   : > { %p547_p7 = pnand %p546_p4, %p655_p5 }
  0xff   : > { %p552_p11 = por %p551_p10, %p550_p9 }
 0x100   : > { %p548_p8 = pneg %p547_p7 }
 0x101   : > { %p554_p13 = por %p553_p12, %p552_p11 }
 0x103   : > { %p555_p0 = pnand %p554_p13, %p548_p8 }
 0x105   : > { %558 = shalt.err (!%p555_p0)
}
 0x106   : > { %491 = dma.vmem_to_hbm [thread:$0]  (%p655_p5), %s778_s27, 512, %s776_s4, %s372_s16  }
 0x107 PF: > { %p497_p1 = scmp.ge.s32.totalorder %s593_s15, 2  ;;  %s398_s20 = sand.u32 1, %s581_s12  }
 0x108   : > { %s399_s24 = scalar_lea.sflag [#allocation3], %s398_s20 }
 0x109   : > { %p494_p2 = pnand %p497_p1, %p659_p6 }
 0x10b   : > { %576 = dma.done.wait (!%p494_p2), %s399_s24, 512  }
 0x10c   : > { %578 = vsyncadd (!%p494_p2), %s399_s24, 4294966784  ;;  %p13_p3 = scmp.ge.s32.totalorder %s642_s18, 4   ;;  %s824_s12 = smov %s585_s13 }
 0x10d   : > { %s825_s13 = smov %s589_s14  ;;  %s826_s14 = smov %s653_s21 }
 0x10e   : > { %s827_s15 = smov %s642_s18  ;;  %15 = sbr.rel (!%p13_p3) target bundleno = 3 (0x3), region = 67 }
 0x115   :  { %404 = vsyncpa [#allocation3], 1 }
 0x116   :  { %406 = vsyncpa [#allocation3 + $0x1], 1 }

</bundles_post_ra>
